<compile_context>
chip_gen: v5e
topology: v5e:2x2
jax: 0.10.0
libtpu: 0.0.40
codegen_flags: <defaults>
</compile_context>

<pallas_src>
import jax
import jax.numpy as jnp
from jax.experimental import pallas as pl
from jax.experimental.pallas import tpu as pltpu


def _cdiv(a, b):
    return -(-a // b)


def _round_up(a, b):
    return _cdiv(a, b) * b


def _sublane_pack(dtype):
    # f32 -> 8, bf16 -> 16, int8/fp8 -> 32 sublane packing.
    return max(8, 32 // jnp.dtype(dtype).itemsize)


def _vmem_budget_bytes():
    """(physical_vmem_bytes, tile_budget_bytes) — generation aware."""
    try:
        info = pltpu.get_tpu_info()
        cap = int(getattr(info, "vmem_capacity_bytes", 64 << 20))
    except Exception:  # no TPU info available: assume the smallest (v7x-sized) VMEM
        cap = 64 << 20
    # ~half of physical VMEM for the double-buffered tiles, capped at 48 MiB:
    # v5e/v6e (128 MiB) -> 48 MiB, v7x (64 MiB) -> 32 MiB.  The remainder stays
    # free for resident weight/bias, Mosaic internal scratch and semaphores.
    tile_budget = min(cap // 2, 48 << 20)
    return cap, tile_budget


def _vmem_limit(cap, need_bytes):
    # Never request (nearly) all of physical VMEM; always leave >=8 MiB headroom.
    return int(min(cap - (8 << 20), max(32 << 20, need_bytes)))


# ----------------------------------------------------------------------------- #
# Path A: tiny C (< sublane pack) and HW % 128 == 0.
# x viewed as (N, C, HW/128, 128): each channel tile is a fully dense (rows, 128)
# slab; channel mix is C^2 VPU scalar*vector FMAs with weights/bias in SMEM.
# ----------------------------------------------------------------------------- #
def _residual_dense_vpu_kernel(x_ref, w_ref, b_ref, o_ref):
    # x_ref/o_ref: (1, C, tr, 128) VMEM; w_ref: (C, C) f32 SMEM; b_ref: (C,) f32 SMEM
    C = x_ref.shape[1]
    for o in range(C):
        acc = x_ref[0, o].astype(jnp.float32) + b_ref[o]          # residual + bias
        for k in range(C):
            acc = acc + w_ref[o, k] * x_ref[0, k].astype(jnp.float32)
        o_ref[0, o] = acc.astype(o_ref.dtype)


def _residual_dense_vpu(x_nchw, w2d, bias, tile_budget, cap):
    N, C, H, W = x_nchw.shape
    HW = H * W
    R = HW // 128
    dtype = x_nchw.dtype
    itemsize = jnp.dtype(dtype).itemsize

    x4 = x_nchw.reshape(N, C, R, 128)            # pure reshape: no copy, no transpose

    if R <= 8:
        tr = R                                   # single full-extent block
    else:
        bytes_per_row = 4 * C * 128 * itemsize   # x + out, double-buffered
        cap_rows = max(8, (tile_budget // bytes_per_row) // 8 * 8)
        want_blocks = max(1, _cdiv(4, N))        # aim for >=4 parallel grid steps
        tr_target = max(8, _round_up(_cdiv(R, want_blocks), 8))
        tr = min(cap_rows, tr_target, (R // 8) * 8)
    grid = (N, _cdiv(R, tr))                     # ragged R handled by masked last block

    need = 4 * C * tr * 128 * itemsize + (8 << 20)
    out4 = pl.pallas_call(
        _residual_dense_vpu_kernel,
        out_shape=jax.ShapeDtypeStruct((N, C, R, 128), dtype),
        grid_spec=pltpu.PrefetchScalarGridSpec(
            num_scalar_prefetch=0,
            grid=grid,
            in_specs=[
                pl.BlockSpec((1, C, tr, 128), lambda n, s: (n, 0, s, 0)),
                pl.BlockSpec(memory_space=pltpu.MemorySpace.SMEM),   # weight scalars
                pl.BlockSpec(memory_space=pltpu.MemorySpace.SMEM),   # bias scalars
            ],
            out_specs=pl.BlockSpec((1, C, tr, 128), lambda n, s: (n, 0, s, 0)),
        ),
        compiler_params=pltpu.CompilerParams(
            dimension_semantics=("parallel", "parallel"),
            vmem_limit_bytes=_vmem_limit(cap, need),
        ),
    )(x4, w2d.astype(jnp.float32), bias.astype(jnp.float32))
    return out4.reshape(N, C, H, W)


# ----------------------------------------------------------------------------- #
# Path B: general C.  x viewed as (N, C, HW); 1x1 conv is W @ x[n] on the MXU with
# HW on the lane axis.  Ragged HW -> masked boundary block (no pad / slice copies).
# Optional C_out tiling (innermost grid axis) keeps huge weights out of VMEM.
# ----------------------------------------------------------------------------- #
def _residual_mxu_kernel(x_ref, w_ref, b_ref, o_ref):
    # x_ref: (1, C, ts); w_ref: (tco, C); b_ref: (tco, 1); o_ref: (1, tco, ts)
    x = x_ref[0]                                                        # (C, ts)
    y = jnp.dot(w_ref[...], x, preferred_element_type=jnp.float32)     # (tco, ts)
    tco = o_ref.shape[1]
    if tco == x_ref.shape[1]:                  # static: no channel-out tiling
        xr = x
    else:                                      # residual slice for this C_out block
        start = pl.multiple_of(pl.program_id(2) * tco, 8)
        xr = x_ref[0, pl.ds(start, tco), :]
    o_ref[0] = (y + b_ref[...] + xr.astype(jnp.float32)).astype(o_ref.dtype)


def _residual_mxu(x_nchw, w2d, bias, tile_budget, cap, sub):
    N, C, H, W = x_nchw.shape
    HW = H * W
    dtype = x_nchw.dtype
    itemsize = jnp.dtype(dtype).itemsize
    Cpad = _round_up(C, sub)                      # sublane-padded footprint

    x3 = x_nchw.reshape(N, C, HW)                 # pure reshape: no copy, no transpose

    # Channel-out tiling only when the resident weight would be uncomfortably big.
    w_bytes = Cpad * Cpad * itemsize
    tco = C
    if w_bytes > (8 << 20) and C % 8 == 0:
        tco_cap = max(8, ((8 << 20) // (2 * Cpad * itemsize)) // 8 * 8)
        tco = 8
        for cand in range(max(8, min(C, tco_cap)), 7, -8):
            if C % cand == 0:
                tco = cand
                break
    out_cpad = _round_up(tco, sub)

    # Spatial tile on the lane axis: as big as the VMEM budget allows, but keep
    # >=4 parallel grid steps when possible; ragged tail handled by masking.
    if HW <= 128:
        ts = HW                                   # full-extent block (always legal)
    else:
        bytes_per_col = 2 * (Cpad + out_cpad) * itemsize   # x + out, double-buffered
        cap_cols = max(128, (tile_budget // bytes_per_col) // 128 * 128)
        want_blocks = max(1, _cdiv(4, N))
        ts_target = max(128, _round_up(_cdiv(HW, want_blocks), 128))
        ts = min(cap_cols, ts_target, (HW // 128) * 128)

    grid = (N, _cdiv(HW, ts), _cdiv(C, tco))      # C_out innermost: x not re-fetched

    need = (2 * Cpad * ts + 2 * out_cpad * ts + 2 * out_cpad * Cpad) * itemsize \
        + 4 * C + (8 << 20)
    out3 = pl.pallas_call(
        _residual_mxu_kernel,
        out_shape=jax.ShapeDtypeStruct((N, C, HW), dtype),
        grid_spec=pltpu.PrefetchScalarGridSpec(
            num_scalar_prefetch=0,
            grid=grid,
            in_specs=[
                pl.BlockSpec((1, C, ts), lambda n, s, co: (n, 0, s)),   # x tile
                pl.BlockSpec((tco, C), lambda n, s, co: (co, 0)),       # weight
                pl.BlockSpec((tco, 1), lambda n, s, co: (co, 0)),       # bias
            ],
            out_specs=pl.BlockSpec((1, tco, ts), lambda n, s, co: (n, co, s)),
        ),
        compiler_params=pltpu.CompilerParams(
            dimension_semantics=("parallel", "parallel", "parallel"),
            vmem_limit_bytes=_vmem_limit(cap, need),
        ),
    )(x3, w2d.astype(dtype), bias.reshape(C, 1).astype(jnp.float32))
    return out3.reshape(N, C, H, W)


def residual_conv1x1(x_nchw, weight, bias):
    """out = conv1x1(x) + x, input/output in NCHW (matching PyTorch)."""
    N, C, H, W = x_nchw.shape
    HW = H * W
    sub = _sublane_pack(x_nchw.dtype)
    cap, tile_budget = _vmem_budget_bytes()
    w2d = weight.reshape(C, C)                    # PyTorch Conv2d weight (C,C,1,1)

    if C < sub and HW % 128 == 0:
        # Tiny channel count: dense-vreg VPU path (spatial fills the sublane axis).
        return _residual_dense_vpu(x_nchw, w2d, bias, tile_budget, cap)
    return _residual_mxu(x_nchw, w2d, bias, tile_budget, cap, sub)


def _reference(x, weight, bias):
    C = weight.shape[0]
    return (jnp.einsum("oc,nchw->nohw", weight.reshape(C, C), x)
            + bias[None, :, None, None] + x)


if __name__ == "__main__":
    key = jax.random.PRNGKey(0)
    kx, kw, kb = jax.random.split(key, 3)

    # Primary demo shape (exercises the tiny-C dense VPU path).
    N, C, H, W = 2, 4, 16, 16
    x = jax.random.normal(kx, (N, C, H, W), dtype=jnp.float32)
    weight = jax.random.normal(kw, (C, C, 1, 1), dtype=jnp.float32) * 0.1
    bias = jax.random.normal(kb, (C,), dtype=jnp.float32) * 0.1

    out = jax.block_until_ready(residual_conv1x1(x, weight, bias))
    assert out.shape == (N, C, H, W)
    assert jnp.allclose(out, _reference(x, weight, bias), atol=1e-5, rtol=1e-5)

    # Also exercise the MXU path (C >= sublane pack) and the ragged-H*W path
    # (masked boundary block in-kernel; no jnp.pad / output-slice copies).
    for (n2, c2, h2, w2) in [(2, 8, 16, 16), (1, 8, 15, 15)]:
        k1, k2, k3 = jax.random.split(jax.random.PRNGKey(1), 3)
        x2 = jax.random.normal(k1, (n2, c2, h2, w2), dtype=jnp.float32)
        wt2 = jax.random.normal(k2, (c2, c2, 1, 1), dtype=jnp.float32) * 0.1
        b2 = jax.random.normal(k3, (c2,), dtype=jnp.float32) * 0.1
        o2 = jax.block_until_ready(residual_conv1x1(x2, wt2, b2))
        assert jnp.allclose(o2, _reference(x2, wt2, b2), atol=1e-5, rtol=1e-5)

    print("KERNEL_OK")
</pallas_src>

<mosaic_0001>
module attributes {stable_mosaic.version = 11 : i64} {
  func.func @_residual_dense_vpu_kernel(%arg0: i32, %arg1: i32, %arg2: memref<1x4x2x128xf32, #tpu.memory_space<vmem>>, %arg3: memref<4x4xf32, #tpu.memory_space<smem>>, %arg4: memref<4xf32, #tpu.memory_space<smem>>, %arg5: memref<1x4x2x128xf32, #tpu.memory_space<vmem>>) attributes {dimension_semantics = [#tpu.dimension_semantics<parallel>, #tpu.dimension_semantics<parallel>], iteration_bounds = array<i64: 2, 1>, scalar_prefetch = 0 : i64, scratch_operands = 0 : i64, tpu.core_type = #tpu.core_type<tc>, window_params = [{transform_indices = @transform_0, window_bounds = array<i64: 1, 4, 2, 128>}, {transform_indices = @transform_1, window_bounds = array<i64: 4, 4>}, {transform_indices = @transform_2, window_bounds = array<i64: 4>}, {transform_indices = @transform_3, window_bounds = array<i64: 1, 4, 2, 128>}]} {
    %c0 = arith.constant 0 : index
    %c0_0 = arith.constant 0 : index
    %c0_1 = arith.constant 0 : index
    %c0_2 = arith.constant 0 : index
    %0 = vector.load %arg2[%c0, %c0_0, %c0_1, %c0_2] : memref<1x4x2x128xf32, #tpu.memory_space<vmem>>, vector<1x1x2x128xf32>
    %1 = vector.shape_cast %0 : vector<1x1x2x128xf32> to vector<2x128xf32>
    %c0_3 = arith.constant 0 : index
    %2 = memref.load %arg4[%c0_3] : memref<4xf32, #tpu.memory_space<smem>>
    %3 = vector.broadcast %2 : f32 to vector<2x128xf32>
    %4 = arith.addf %1, %3 : vector<2x128xf32>
    %c0_4 = arith.constant 0 : index
    %c0_5 = arith.constant 0 : index
    %5 = memref.load %arg3[%c0_4, %c0_5] : memref<4x4xf32, #tpu.memory_space<smem>>
    %c0_6 = arith.constant 0 : index
    %c0_7 = arith.constant 0 : index
    %c0_8 = arith.constant 0 : index
    %c0_9 = arith.constant 0 : index
    %6 = vector.load %arg2[%c0_6, %c0_7, %c0_8, %c0_9] : memref<1x4x2x128xf32, #tpu.memory_space<vmem>>, vector<1x1x2x128xf32>
    %7 = vector.shape_cast %6 : vector<1x1x2x128xf32> to vector<2x128xf32>
    %8 = vector.broadcast %5 : f32 to vector<2x128xf32>
    %9 = arith.mulf %8, %7 : vector<2x128xf32>
    %10 = arith.addf %4, %9 : vector<2x128xf32>
    %c0_10 = arith.constant 0 : index
    %c1 = arith.constant 1 : index
    %11 = memref.load %arg3[%c0_10, %c1] : memref<4x4xf32, #tpu.memory_space<smem>>
    %c0_11 = arith.constant 0 : index
    %c1_12 = arith.constant 1 : index
    %c0_13 = arith.constant 0 : index
    %c0_14 = arith.constant 0 : index
    %12 = vector.load %arg2[%c0_11, %c1_12, %c0_13, %c0_14] : memref<1x4x2x128xf32, #tpu.memory_space<vmem>>, vector<1x1x2x128xf32>
    %13 = vector.shape_cast %12 : vector<1x1x2x128xf32> to vector<2x128xf32>
    %14 = vector.broadcast %11 : f32 to vector<2x128xf32>
    %15 = arith.mulf %14, %13 : vector<2x128xf32>
    %16 = arith.addf %10, %15 : vector<2x128xf32>
    %c0_15 = arith.constant 0 : index
    %c2 = arith.constant 2 : index
    %17 = memref.load %arg3[%c0_15, %c2] : memref<4x4xf32, #tpu.memory_space<smem>>
    %c0_16 = arith.constant 0 : index
    %c2_17 = arith.constant 2 : index
    %c0_18 = arith.constant 0 : index
    %c0_19 = arith.constant 0 : index
    %18 = vector.load %arg2[%c0_16, %c2_17, %c0_18, %c0_19] : memref<1x4x2x128xf32, #tpu.memory_space<vmem>>, vector<1x1x2x128xf32>
    %19 = vector.shape_cast %18 : vector<1x1x2x128xf32> to vector<2x128xf32>
    %20 = vector.broadcast %17 : f32 to vector<2x128xf32>
    %21 = arith.mulf %20, %19 : vector<2x128xf32>
    %22 = arith.addf %16, %21 : vector<2x128xf32>
    %c0_20 = arith.constant 0 : index
    %c3 = arith.constant 3 : index
    %23 = memref.load %arg3[%c0_20, %c3] : memref<4x4xf32, #tpu.memory_space<smem>>
    %c0_21 = arith.constant 0 : index
    %c3_22 = arith.constant 3 : index
    %c0_23 = arith.constant 0 : index
    %c0_24 = arith.constant 0 : index
    %24 = vector.load %arg2[%c0_21, %c3_22, %c0_23, %c0_24] : memref<1x4x2x128xf32, #tpu.memory_space<vmem>>, vector<1x1x2x128xf32>
    %25 = vector.shape_cast %24 : vector<1x1x2x128xf32> to vector<2x128xf32>
    %26 = vector.broadcast %23 : f32 to vector<2x128xf32>
    %27 = arith.mulf %26, %25 : vector<2x128xf32>
    %28 = arith.addf %22, %27 : vector<2x128xf32>
    %c0_25 = arith.constant 0 : index
    %c0_26 = arith.constant 0 : index
    %c0_27 = arith.constant 0 : index
    %c0_28 = arith.constant 0 : index
    %29 = vector.load %arg5[%c0_25, %c0_26, %c0_27, %c0_28] : memref<1x4x2x128xf32, #tpu.memory_space<vmem>>, vector<1x1x2x128xf32>
    %30 = vector.shape_cast %29 : vector<1x1x2x128xf32> to vector<2x128xf32>
    %31 = vector.shape_cast %28 : vector<2x128xf32> to vector<1x1x2x128xf32>
    tpu.vector_store %arg5[%c0_25, %c0_26, %c0_27, %c0_28], %31 {strides = array<i32>} : memref<1x4x2x128xf32, #tpu.memory_space<vmem>>, vector<1x1x2x128xf32>,
    %c0_29 = arith.constant 0 : index
    %c1_30 = arith.constant 1 : index
    %c0_31 = arith.constant 0 : index
    %c0_32 = arith.constant 0 : index
    %32 = vector.load %arg2[%c0_29, %c1_30, %c0_31, %c0_32] : memref<1x4x2x128xf32, #tpu.memory_space<vmem>>, vector<1x1x2x128xf32>
    %33 = vector.shape_cast %32 : vector<1x1x2x128xf32> to vector<2x128xf32>
    %c1_33 = arith.constant 1 : index
    %34 = memref.load %arg4[%c1_33] : memref<4xf32, #tpu.memory_space<smem>>
    %35 = vector.broadcast %34 : f32 to vector<2x128xf32>
    %36 = arith.addf %33, %35 : vector<2x128xf32>
    %c1_34 = arith.constant 1 : index
    %c0_35 = arith.constant 0 : index
    %37 = memref.load %arg3[%c1_34, %c0_35] : memref<4x4xf32, #tpu.memory_space<smem>>
    %c0_36 = arith.constant 0 : index
    %c0_37 = arith.constant 0 : index
    %c0_38 = arith.constant 0 : index
    %c0_39 = arith.constant 0 : index
    %38 = vector.load %arg2[%c0_36, %c0_37, %c0_38, %c0_39] : memref<1x4x2x128xf32, #tpu.memory_space<vmem>>, vector<1x1x2x128xf32>
    %39 = vector.shape_cast %38 : vector<1x1x2x128xf32> to vector<2x128xf32>
    %40 = vector.broadcast %37 : f32 to vector<2x128xf32>
    %41 = arith.mulf %40, %39 : vector<2x128xf32>
    %42 = arith.addf %36, %41 : vector<2x128xf32>
    %c1_40 = arith.constant 1 : index
    %c1_41 = arith.constant 1 : index
    %43 = memref.load %arg3[%c1_40, %c1_41] : memref<4x4xf32, #tpu.memory_space<smem>>
    %c0_42 = arith.constant 0 : index
    %c1_43 = arith.constant 1 : index
    %c0_44 = arith.constant 0 : index
    %c0_45 = arith.constant 0 : index
    %44 = vector.load %arg2[%c0_42, %c1_43, %c0_44, %c0_45] : memref<1x4x2x128xf32, #tpu.memory_space<vmem>>, vector<1x1x2x128xf32>
    %45 = vector.shape_cast %44 : vector<1x1x2x128xf32> to vector<2x128xf32>
    %46 = vector.broadcast %43 : f32 to vector<2x128xf32>
    %47 = arith.mulf %46, %45 : vector<2x128xf32>
    %48 = arith.addf %42, %47 : vector<2x128xf32>
    %c1_46 = arith.constant 1 : index
    %c2_47 = arith.constant 2 : index
    %49 = memref.load %arg3[%c1_46, %c2_47] : memref<4x4xf32, #tpu.memory_space<smem>>
    %c0_48 = arith.constant 0 : index
    %c2_49 = arith.constant 2 : index
    %c0_50 = arith.constant 0 : index
    %c0_51 = arith.constant 0 : index
    %50 = vector.load %arg2[%c0_48, %c2_49, %c0_50, %c0_51] : memref<1x4x2x128xf32, #tpu.memory_space<vmem>>, vector<1x1x2x128xf32>
    %51 = vector.shape_cast %50 : vector<1x1x2x128xf32> to vector<2x128xf32>
    %52 = vector.broadcast %49 : f32 to vector<2x128xf32>
    %53 = arith.mulf %52, %51 : vector<2x128xf32>
    %54 = arith.addf %48, %53 : vector<2x128xf32>
    %c1_52 = arith.constant 1 : index
    %c3_53 = arith.constant 3 : index
    %55 = memref.load %arg3[%c1_52, %c3_53] : memref<4x4xf32, #tpu.memory_space<smem>>
    %c0_54 = arith.constant 0 : index
    %c3_55 = arith.constant 3 : index
    %c0_56 = arith.constant 0 : index
    %c0_57 = arith.constant 0 : index
    %56 = vector.load %arg2[%c0_54, %c3_55, %c0_56, %c0_57] : memref<1x4x2x128xf32, #tpu.memory_space<vmem>>, vector<1x1x2x128xf32>
    %57 = vector.shape_cast %56 : vector<1x1x2x128xf32> to vector<2x128xf32>
    %58 = vector.broadcast %55 : f32 to vector<2x128xf32>
    %59 = arith.mulf %58, %57 : vector<2x128xf32>
    %60 = arith.addf %54, %59 : vector<2x128xf32>
    %c0_58 = arith.constant 0 : index
    %c1_59 = arith.constant 1 : index
    %c0_60 = arith.constant 0 : index
    %c0_61 = arith.constant 0 : index
    %61 = vector.load %arg5[%c0_58, %c1_59, %c0_60, %c0_61] : memref<1x4x2x128xf32, #tpu.memory_space<vmem>>, vector<1x1x2x128xf32>
    %62 = vector.shape_cast %61 : vector<1x1x2x128xf32> to vector<2x128xf32>
    %63 = vector.shape_cast %60 : vector<2x128xf32> to vector<1x1x2x128xf32>
    tpu.vector_store %arg5[%c0_58, %c1_59, %c0_60, %c0_61], %63 {strides = array<i32>} : memref<1x4x2x128xf32, #tpu.memory_space<vmem>>, vector<1x1x2x128xf32>,
    %c0_62 = arith.constant 0 : index
    %c2_63 = arith.constant 2 : index
    %c0_64 = arith.constant 0 : index
    %c0_65 = arith.constant 0 : index
    %64 = vector.load %arg2[%c0_62, %c2_63, %c0_64, %c0_65] : memref<1x4x2x128xf32, #tpu.memory_space<vmem>>, vector<1x1x2x128xf32>
    %65 = vector.shape_cast %64 : vector<1x1x2x128xf32> to vector<2x128xf32>
    %c2_66 = arith.constant 2 : index
    %66 = memref.load %arg4[%c2_66] : memref<4xf32, #tpu.memory_space<smem>>
    %67 = vector.broadcast %66 : f32 to vector<2x128xf32>
    %68 = arith.addf %65, %67 : vector<2x128xf32>
    %c2_67 = arith.constant 2 : index
    %c0_68 = arith.constant 0 : index
    %69 = memref.load %arg3[%c2_67, %c0_68] : memref<4x4xf32, #tpu.memory_space<smem>>
    %c0_69 = arith.constant 0 : index
    %c0_70 = arith.constant 0 : index
    %c0_71 = arith.constant 0 : index
    %c0_72 = arith.constant 0 : index
    %70 = vector.load %arg2[%c0_69, %c0_70, %c0_71, %c0_72] : memref<1x4x2x128xf32, #tpu.memory_space<vmem>>, vector<1x1x2x128xf32>
    %71 = vector.shape_cast %70 : vector<1x1x2x128xf32> to vector<2x128xf32>
    %72 = vector.broadcast %69 : f32 to vector<2x128xf32>
    %73 = arith.mulf %72, %71 : vector<2x128xf32>
    %74 = arith.addf %68, %73 : vector<2x128xf32>
    %c2_73 = arith.constant 2 : index
    %c1_74 = arith.constant 1 : index
    %75 = memref.load %arg3[%c2_73, %c1_74] : memref<4x4xf32, #tpu.memory_space<smem>>
    %c0_75 = arith.constant 0 : index
    %c1_76 = arith.constant 1 : index
    %c0_77 = arith.constant 0 : index
    %c0_78 = arith.constant 0 : index
    %76 = vector.load %arg2[%c0_75, %c1_76, %c0_77, %c0_78] : memref<1x4x2x128xf32, #tpu.memory_space<vmem>>, vector<1x1x2x128xf32>
    %77 = vector.shape_cast %76 : vector<1x1x2x128xf32> to vector<2x128xf32>
    %78 = vector.broadcast %75 : f32 to vector<2x128xf32>
    %79 = arith.mulf %78, %77 : vector<2x128xf32>
    %80 = arith.addf %74, %79 : vector<2x128xf32>
    %c2_79 = arith.constant 2 : index
    %c2_80 = arith.constant 2 : index
    %81 = memref.load %arg3[%c2_79, %c2_80] : memref<4x4xf32, #tpu.memory_space<smem>>
    %c0_81 = arith.constant 0 : index
    %c2_82 = arith.constant 2 : index
    %c0_83 = arith.constant 0 : index
    %c0_84 = arith.constant 0 : index
    %82 = vector.load %arg2[%c0_81, %c2_82, %c0_83, %c0_84] : memref<1x4x2x128xf32, #tpu.memory_space<vmem>>, vector<1x1x2x128xf32>
    %83 = vector.shape_cast %82 : vector<1x1x2x128xf32> to vector<2x128xf32>
    %84 = vector.broadcast %81 : f32 to vector<2x128xf32>
    %85 = arith.mulf %84, %83 : vector<2x128xf32>
    %86 = arith.addf %80, %85 : vector<2x128xf32>
    %c2_85 = arith.constant 2 : index
    %c3_86 = arith.constant 3 : index
    %87 = memref.load %arg3[%c2_85, %c3_86] : memref<4x4xf32, #tpu.memory_space<smem>>
    %c0_87 = arith.constant 0 : index
    %c3_88 = arith.constant 3 : index
    %c0_89 = arith.constant 0 : index
    %c0_90 = arith.constant 0 : index
    %88 = vector.load %arg2[%c0_87, %c3_88, %c0_89, %c0_90] : memref<1x4x2x128xf32, #tpu.memory_space<vmem>>, vector<1x1x2x128xf32>
    %89 = vector.shape_cast %88 : vector<1x1x2x128xf32> to vector<2x128xf32>
    %90 = vector.broadcast %87 : f32 to vector<2x128xf32>
    %91 = arith.mulf %90, %89 : vector<2x128xf32>
    %92 = arith.addf %86, %91 : vector<2x128xf32>
    %c0_91 = arith.constant 0 : index
    %c2_92 = arith.constant 2 : index
    %c0_93 = arith.constant 0 : index
    %c0_94 = arith.constant 0 : index
    %93 = vector.load %arg5[%c0_91, %c2_92, %c0_93, %c0_94] : memref<1x4x2x128xf32, #tpu.memory_space<vmem>>, vector<1x1x2x128xf32>
    %94 = vector.shape_cast %93 : vector<1x1x2x128xf32> to vector<2x128xf32>
    %95 = vector.shape_cast %92 : vector<2x128xf32> to vector<1x1x2x128xf32>
    tpu.vector_store %arg5[%c0_91, %c2_92, %c0_93, %c0_94], %95 {strides = array<i32>} : memref<1x4x2x128xf32, #tpu.memory_space<vmem>>, vector<1x1x2x128xf32>,
    %c0_95 = arith.constant 0 : index
    %c3_96 = arith.constant 3 : index
    %c0_97 = arith.constant 0 : index
    %c0_98 = arith.constant 0 : index
    %96 = vector.load %arg2[%c0_95, %c3_96, %c0_97, %c0_98] : memref<1x4x2x128xf32, #tpu.memory_space<vmem>>, vector<1x1x2x128xf32>
    %97 = vector.shape_cast %96 : vector<1x1x2x128xf32> to vector<2x128xf32>
    %c3_99 = arith.constant 3 : index
    %98 = memref.load %arg4[%c3_99] : memref<4xf32, #tpu.memory_space<smem>>
    %99 = vector.broadcast %98 : f32 to vector<2x128xf32>
    %100 = arith.addf %97, %99 : vector<2x128xf32>
    %c3_100 = arith.constant 3 : index
    %c0_101 = arith.constant 0 : index
    %101 = memref.load %arg3[%c3_100, %c0_101] : memref<4x4xf32, #tpu.memory_space<smem>>
    %c0_102 = arith.constant 0 : index
    %c0_103 = arith.constant 0 : index
    %c0_104 = arith.constant 0 : index
    %c0_105 = arith.constant 0 : index
    %102 = vector.load %arg2[%c0_102, %c0_103, %c0_104, %c0_105] : memref<1x4x2x128xf32, #tpu.memory_space<vmem>>, vector<1x1x2x128xf32>
    %103 = vector.shape_cast %102 : vector<1x1x2x128xf32> to vector<2x128xf32>
    %104 = vector.broadcast %101 : f32 to vector<2x128xf32>
    %105 = arith.mulf %104, %103 : vector<2x128xf32>
    %106 = arith.addf %100, %105 : vector<2x128xf32>
    %c3_106 = arith.constant 3 : index
    %c1_107 = arith.constant 1 : index
    %107 = memref.load %arg3[%c3_106, %c1_107] : memref<4x4xf32, #tpu.memory_space<smem>>
    %c0_108 = arith.constant 0 : index
    %c1_109 = arith.constant 1 : index
    %c0_110 = arith.constant 0 : index
    %c0_111 = arith.constant 0 : index
    %108 = vector.load %arg2[%c0_108, %c1_109, %c0_110, %c0_111] : memref<1x4x2x128xf32, #tpu.memory_space<vmem>>, vector<1x1x2x128xf32>
    %109 = vector.shape_cast %108 : vector<1x1x2x128xf32> to vector<2x128xf32>
    %110 = vector.broadcast %107 : f32 to vector<2x128xf32>
    %111 = arith.mulf %110, %109 : vector<2x128xf32>
    %112 = arith.addf %106, %111 : vector<2x128xf32>
    %c3_112 = arith.constant 3 : index
    %c2_113 = arith.constant 2 : index
    %113 = memref.load %arg3[%c3_112, %c2_113] : memref<4x4xf32, #tpu.memory_space<smem>>
    %c0_114 = arith.constant 0 : index
    %c2_115 = arith.constant 2 : index
    %c0_116 = arith.constant 0 : index
    %c0_117 = arith.constant 0 : index
    %114 = vector.load %arg2[%c0_114, %c2_115, %c0_116, %c0_117] : memref<1x4x2x128xf32, #tpu.memory_space<vmem>>, vector<1x1x2x128xf32>
    %115 = vector.shape_cast %114 : vector<1x1x2x128xf32> to vector<2x128xf32>
    %116 = vector.broadcast %113 : f32 to vector<2x128xf32>
    %117 = arith.mulf %116, %115 : vector<2x128xf32>
    %118 = arith.addf %112, %117 : vector<2x128xf32>
    %c3_118 = arith.constant 3 : index
    %c3_119 = arith.constant 3 : index
    %119 = memref.load %arg3[%c3_118, %c3_119] : memref<4x4xf32, #tpu.memory_space<smem>>
    %c0_120 = arith.constant 0 : index
    %c3_121 = arith.constant 3 : index
    %c0_122 = arith.constant 0 : index
    %c0_123 = arith.constant 0 : index
    %120 = vector.load %arg2[%c0_120, %c3_121, %c0_122, %c0_123] : memref<1x4x2x128xf32, #tpu.memory_space<vmem>>, vector<1x1x2x128xf32>
    %121 = vector.shape_cast %120 : vector<1x1x2x128xf32> to vector<2x128xf32>
    %122 = vector.broadcast %119 : f32 to vector<2x128xf32>
    %123 = arith.mulf %122, %121 : vector<2x128xf32>
    %124 = arith.addf %118, %123 : vector<2x128xf32>
    %c0_124 = arith.constant 0 : index
    %c3_125 = arith.constant 3 : index
    %c0_126 = arith.constant 0 : index
    %c0_127 = arith.constant 0 : index
    %125 = vector.load %arg5[%c0_124, %c3_125, %c0_126, %c0_127] : memref<1x4x2x128xf32, #tpu.memory_space<vmem>>, vector<1x1x2x128xf32>
    %126 = vector.shape_cast %125 : vector<1x1x2x128xf32> to vector<2x128xf32>
    %127 = vector.shape_cast %124 : vector<2x128xf32> to vector<1x1x2x128xf32>
    tpu.vector_store %arg5[%c0_124, %c3_125, %c0_126, %c0_127], %127 {strides = array<i32>} : memref<1x4x2x128xf32, #tpu.memory_space<vmem>>, vector<1x1x2x128xf32>,
    return
  }
  func.func @transform_0(%arg0: i32, %arg1: i32) -> (i32, i32, i32, i32) {
    %c0_i32 = arith.constant 0 : i32
    %c0_i32_0 = arith.constant 0 : i32
    %c0_i32_1 = arith.constant 0 : i32
    return %arg0, %c0_i32, %arg1, %c0_i32_0 : i32, i32, i32, i32
  }
  func.func @transform_1(%arg0: i32, %arg1: i32) -> (i32, i32) {
    %c0_i32 = arith.constant 0 : i32
    %c0_i32_0 = arith.constant 0 : i32
    %c0_i32_1 = arith.constant 0 : i32
    return %c0_i32, %c0_i32_0 : i32, i32
  }
  func.func @transform_2(%arg0: i32, %arg1: i32) -> i32 {
    %c0_i32 = arith.constant 0 : i32
    %c0_i32_0 = arith.constant 0 : i32
    return %c0_i32 : i32
  }
  func.func @transform_3(%arg0: i32, %arg1: i32) -> (i32, i32, i32, i32) {
    %c0_i32 = arith.constant 0 : i32
    %c0_i32_0 = arith.constant 0 : i32
    %c0_i32_1 = arith.constant 0 : i32
    return %arg0, %c0_i32, %arg1, %c0_i32_0 : i32, i32, i32, i32
  }
}

</mosaic_0001>

<bundles_post_ra>
// kernel: tpu_custom_call.1
= control target key start
LH: loop header
LB: loop body
LE: loop exit
PB: predicated region body
PF: predicated region fallthrough
CT: control target
= control target key end

     0   :  { %s987_s0 = inlined_call_operand.hbm [shape: f32[2,4,2,128], index: 0, kind: input, shape index: {}]   ;;  %s988_s1 = inlined_call_operand.hbm [shape: f32[4,4], index: 1, kind: input, shape index: {}]   ;;  %s989_s2 = inlined_call_operand.vmem [shape: f32[4], index: 2, kind: input, shape index: {}]   ;;  %s990_s3 = inlined_call_operand.hbm [shape: f32[2,4,2,128], index: 3, kind: output, shape index: {}]  }
   0x1   :  { %991 = sst [smem:[#allocation14_spill]] %s988_s1 }
   0x2   :  { %8 = vsyncpa [#allocation3], 0 }
   0x3   :  { %10 = vsyncpa [#allocation3 + $0x1], 0 }
   0x4   :  { %11 = vsyncpa [#allocation5], 0 }
   0x5   :  { %12 = vsyncpa [#allocation6], 0 }
   0x6   :  { %13 = vsyncpa [#allocation4], 0 }
   0x7   :  { %15 = vsyncpa [#allocation4 + $0x1], 0  ;;  %s782_s12 = smov 0   ;;  %s784_s13 = smov 0  }
   0x8   :  { %s786_s14 = smov 0   ;;  %s788_s15 = smov 0  }
   0x9   :  { %s790_s16 = smov 0   ;;  %s792_s17 = smov 0  }
   0xa LB: > { %s463_s18 = sadd.s32 4294967295, %s754_s17   ;;  %s464_s19 = sadd.s32 4294967294, %s754_s17   ;;  %s754_s17 = sphi %s792_s17, %s21_s17   ;;  %s750_s16 = sphi %s790_s16, %s1004_s16   ;;  %s746_s15 = sphi %s788_s15, %s1003_s15   ;;  %s742_s14 = sphi %s786_s14, %s1002_s14   ;;  %s738_s13 = sphi %s784_s13, %s1001_s13   ;;  %s734_s12 = sphi %s782_s12, %s1000_s12  }
   0xb   : > { %s42_s20 = sadd.s32 1, %s742_s14  ;;  %p49_p0 = scmp.ne.s32.totalorder %s742_s14, %s738_s13 }
   0xc   : > { %p50_p1 = scmp.eq.s32.totalorder %s754_s17, 0  ;;  %p55_p2 = scmp.ne.s32.totalorder %s738_s13, %s734_s12 }
   0xd   : > { %p820_p3 = scmp.eq.s32.totalorder %s463_s18, 0  ;;  %p123_p4 = scmp.eq.s32.totalorder %s463_s18, 1 }
   0xe   : > { %p824_p5 = por %p50_p1, %p49_p0  ;;  %p129_p6 = scmp.eq.s32.totalorder %s464_s19, 1 }
   0xf   : > { %p830_p7 = por %p820_p3, %p55_p2  ;;  %p834_p8 = por %p123_p4, %p49_p0 }
  0x10   : > { %p838_p9 = por %p129_p6, %p55_p2  ;;  %p465_p10 = scmp.ge.s32.totalorder %s754_s17, 1 }
  0x11   : > { %p136_p11 = scmp.lt.s32.totalorder %s754_s17, 3  ;;  %s997_s1 = sld [smem:[#allocation14_spill]] }
  0x12   : > { %p468_p13 = scmp.ge.s32.totalorder %s754_s17, 2  ;;  %p546_p0 = scmp.lt.s32.totalorder %s754_s17, 2 }
  0x13   : > { %p847_p12 = pnand %p465_p10, %p136_p11  ;;  %s158_s5 = sshll.u32 %s989_s2, 4  ;;  %s159_s5 = int_to_ptr.vmem [resolvable:$true] %s158_s5 }
  0x14   : > { %p860_p2 = pnand %p546_p0, %p824_p5  ;;  %s756_s7 = smov [#allocation7]  }
  0x15   : > { %p529_p1 = pneg %p847_p12  ;;  %s757_s8 = smov [#allocation8]  }
  0x16   : > { %s33_s9 = sadd.s32 1, %s750_s16  ;;  %s169_s10 = sand.u32 1, %s742_s14  }
  0x17   : > { %s148_s28 = sshll.u32 %s997_s1, 4  ;;  %p530_p4 = pnand %p529_p1, %p820_p3  ;;  %s149_s28 = int_to_ptr.hbm [resolvable:$true] %s148_s28 }
  0x18   : > { %p35_p6 = scmp.ge.s32.totalorder %s33_s9, 2  ;;  %s469_s11 = sshll.u32 %s169_s10, 3 }
  0x19   : > { %532 = dma.hbm_to_smem (!%p530_p4), %s149_s28, 64, %s756_s7, [#allocation5]  }
  0x1a   : > { %535 = dma.vmem_to_smem (!%p530_p4), %s159_s5, 16, %s757_s8, [#allocation6]  }
  0x1b   : > { %s515_s18 = sshll.u32 %s750_s16, 3  ;;  %s1006_s9 = smov (%p35_p6, %s33_s9), 0 }
  0x1c   : > { %s179_s26 = scalar_lea.hbm %s987_s0, %s515_s18  ;;  %s37_s27 = ssub.s32 %s750_s16, %s1006_s9 }
  0x1d   : > { %s180_s30 = sshll.u32 %s179_s26, 4  ;;  %p40_p5 = scmp.eq.s32.totalorder %s37_s27, 0  ;;  %s181_s30 = int_to_ptr.hbm [resolvable:$true] %s180_s30 }
  0x1e   : > { %s173_s28 = scalar_lea.vmem [#allocation2], %s469_s11  ;;  %s170_s7 = scalar_lea.sflag [#allocation3], %s169_s10 }
  0x1f   : > { %s182_s4 = sshll.u32 %s173_s28, 4  ;;  %s758_s8 = smov 32   ;;  %s183_s4 = int_to_ptr.vmem [resolvable:$true] %s182_s4 }
  0x20   : > { %s879_s5 = scalar_select %p40_p5, %s742_s14, %s42_s20  }
  0x21   : > { %s759_s1 = smov 2   ;;  %194 = sbr.rel (%p847_p12) target bundleno = 82 (0x52), region = 32 }
  0x22   : > { %539 = dma.hbm_to_vmem [thread:$0]  (!%p860_p2), %s181_s30, 128, %s183_s4, %s170_s7, %s758_s8, %s758_s8, %s759_s1  }
  0x23   : > { %s886_s18 = sand.u32 (!%p847_p12), 1, %s738_s13  }
  0x24   : > { %s473_s11 = sshll.u32 (!%p847_p12), %s886_s18, 3  ;;  %s197_s19 = scalar_lea.sflag (!%p847_p12), [#allocation3], %s886_s18 }
  0x25   : > { %s892_s20 = scalar_lea.vmem (!%p847_p12), [#allocation2], %s473_s11 }
  0x26   : > { %717 = dma.done.wait (%p830_p7), %s197_s19, 128  }
  0x27   : > { %719 = vsyncadd (%p830_p7), %s197_s19, 4294967168 }
  0x28   : > { %721 = dma.done.wait (%p820_p3), [#allocation5], 64  }
  0x29   : > { %723 = vsyncadd (%p820_p3), [#allocation5], 4294967232 }
  0x2a   : > { %725 = dma.done.wait (%p820_p3), [#allocation6], 16  }
  0x2b   : > { %727 = vsyncadd (%p820_p3), [#allocation6], 4294967280 }
  0x2c   : > { %216 = sfence }
  0x2d   : > { %s236_s1 = sld [smem:[#allocation8]]  ;;  %v235_v0 = vld [vmem:[%s892_s20] sm:$0x3]  ;;  %v478_v2 = vld [vmem:[%s892_s20 + $0x2] sm:$0x3] }
  0x2e   : > { %s239_s29 = sld [smem:[#allocation7]]  ;;  %v480_v5 = vld [vmem:[%s892_s20 + $0x4] sm:$0x3]  ;;  %v482_v10 = vld [vmem:[%s892_s20 + $0x6] sm:$0x3] }
  0x2f   : > { %s477_s23 = sld [smem:[#allocation7 + $0x1]]  ;;  %v483_v11 = vld [vmem:[%s892_s20 + $0x2] sm:$0x3]  ;;  %v267_v15 = vld [vmem:[%s892_s20] sm:$0x3] }
  0x30   : > { %s479_s6 = sld [smem:[#allocation7 + $0x2]]  ;;  %v488_v21 = vld [vmem:[%s892_s20 + $0x4] sm:$0x3]  ;;  %v490_v27 = vld [vmem:[%s892_s20 + $0x6] sm:$0x3] }
  0x31   : > { %s481_s10 = sld [smem:[#allocation7 + $0x3]]  ;;  %v492_v28 = vld [vmem:[%s892_s20 + $0x4] sm:$0x3]  ;;  %v292_v32 = vld [vmem:[%s892_s20] sm:$0x3] }
  0x32   : > { %s484_s22 = sld [smem:[#allocation8 + $0x1]]  ;;  %v496_v35 = vld [vmem:[%s892_s20 + $0x2] sm:$0x3]  ;;  %v499_v45 = vld [vmem:[%s892_s20 + $0x6] sm:$0x3] }
  0x33   : > { %v237_v1 = vstv %s236_s1  ;;  %s485_s26 = sld [smem:[#allocation7 + $0x80]]  ;;  %v501_v46 = vld [vmem:[%s892_s20 + $0x6] sm:$0x3]  ;;  %v317_v50 = vld [vmem:[%s892_s20] sm:$0x3] }
  0x34   : > { %v238_v3 = vadd.f32 %v237_v1, %v235_v0  ;;  %v240_v4 = vstv %s239_s29  ;;  %s486_s21 = sld [smem:[#allocation7 + $0x81]]  ;;  %v505_v53 = vld [vmem:[%s892_s20 + $0x2] sm:$0x3]  ;;  %v507_v58 = vld [vmem:[%s892_s20 + $0x4] sm:$0x3] }
  0x35   : > { %v241_v6 = vmul.f32 %v240_v4, %v235_v0  ;;  %v246_v7 = vstv %s477_s23  ;;  %s487_s27 = sld [smem:[#allocation7 + $0x82]] }
  0x36   : > { %v247_v8 = vmul.f32 %v478_v2, %v246_v7  ;;  %v252_v9 = vstv %s479_s6  ;;  %s911_s30 = sld [smem:[#allocation7 + $0x83]]  ;;  %s933_s6 = scalar_lea.vmem [#allocation9], %s473_s11 }
  0x37   : > { %v242_v12 = vadd.f32 %v241_v6, %v238_v3  ;;  %v253_v13 = vmul.f32 %v480_v5, %v252_v9  ;;  %v258_v14 = vstv %s481_s10  ;;  %s493_s28 = sld [smem:[#allocation8 + $0x2]]  ;;  %s516_s11 = sshll.u32 %s746_s15, 3 }
  0x38   : > { %v264_v16 = vstv %s484_s22  ;;  %s914_s4 = sld [smem:[#allocation7 + $0x100]]  ;;  %v259_v18 = vmul.f32 %v482_v10, %v258_v14  ;;  %s351_s15 = sshll.u32 %s933_s6, 4  ;;  %s352_s15 = int_to_ptr.vmem [resolvable:$true] %s351_s15 }
  0x39   : > { %v248_v17 = vadd.f32 %v247_v8, %v242_v12  ;;  %v265_v19 = vadd.f32 %v483_v11, %v264_v16  ;;  %v268_v20 = vstv %s485_s26  ;;  %s495_s7 = sld [smem:[#allocation7 + $0x101]] }
  0x3a   : > { %v269_v22 = vmul.f32 %v268_v20, %v267_v15  ;;  %v272_v23 = vstv %s486_s21  ;;  %s917_s8 = sld [smem:[#allocation7 + $0x102]] }
  0x3b   : > { %v254_v24 = vadd.f32 %v253_v13, %v248_v17  ;;  %v273_v25 = vmul.f32 %v483_v11, %v272_v23  ;;  %v277_v26 = vstv %s487_s27  ;;  %s921_s19 = sld [smem:[#allocation7 + $0x103]]  ;;  %s350_s27 = scalar_lea.hbm %s990_s3, %s516_s11 }
  0x3c   : > { %v270_v29 = vadd.f32 %v269_v22, %v265_v19  ;;  %v278_v30 = vmul.f32 %v488_v21, %v277_v26  ;;  %v282_v31 = vstv %s911_s30  ;;  %s925_s1 = sld [smem:[#allocation8 + $0x3]]  ;;  %s353_s20 = sshll.u32 %s350_s27, 4  ;;  %s354_s20 = int_to_ptr.hbm [resolvable:$true] %s353_s20 }
  0x3d   : > { %v260_v33 = vadd.f32 %v259_v18, %v254_v24  ;;  %v289_v34 = vstv %s493_s28  ;;  %s928_s29 = sld [smem:[#allocation7 + $0x180]]  ;;  %v283_v37 = vmul.f32 %v490_v27, %v282_v31  ;;  %s338_s30 = scalar_lea.sflag [#allocation4], %s886_s18 }
  0x3e   : > { %v274_v36 = vadd.f32 %v273_v25, %v270_v29  ;;  %v290_v38 = vadd.f32 %v492_v28, %v289_v34  ;;  %v293_v39 = vstv %s914_s4  ;;  %s504_s23 = sld [smem:[#allocation7 + $0x181]]  ;;  %s678_s28 = sshra.s32 %s354_s20, 4  ;;  %s679_s28 = int_to_ptr.hbm [resolvable:$true] %s678_s28 }
  0x3f   : > { %261 = vst [vmem:[%s933_s6] sm:$0x3] %v260_v33  ;;  %v294_v40 = vmul.f32 %v293_v39, %v292_v32  ;;  %v298_v41 = vstv %s495_s7  ;;  %s506_s10 = sld [smem:[#allocation7 + $0x182]]  ;;  %s680_s4 = scalar_lea.hbm %s679_s28, 8 }
  0x40   : > { %v279_v42 = vadd.f32 %v278_v30, %v274_v36  ;;  %v299_v43 = vmul.f32 %v496_v35, %v298_v41  ;;  %v302_v44 = vstv %s917_s8  ;;  %s508_s22 = sld [smem:[#allocation7 + $0x183]]  ;;  %p681_p3 = scmp.ne.s32.totalorder %s679_s28, %s680_s4 }
  0x41   : > { %v295_v47 = vadd.f32 %v294_v40, %v290_v38  ;;  %v303_v48 = vmul.f32 %v492_v28, %v302_v44  ;;  %v307_v49 = vstv %s921_s19  ;;  %s684_s19 = scalar_lea.hbm %s990_s3, 16  ;;  %p685_p11 = scmp.lt.s32.totalorder %s679_s28, %s990_s3 }
  0x42   : > { %v284_v51 = vadd.f32 %v283_v37, %v279_v42  ;;  %v314_v52 = vstv %s925_s1  ;;  %v308_v55 = vmul.f32 %v499_v45, %v307_v49  ;;  %p682_p7 = pnand %p681_p3, %p834_p8  ;;  %p686_p12 = scmp.lt.s32.totalorder %s684_s19, %s680_s4 }
  0x43   : > { %v300_v54 = vadd.f32 %v299_v43, %v295_v47  ;;  %v315_v56 = vadd.f32 %v501_v46, %v314_v52  ;;  %v318_v57 = vstv %s928_s29 }
  0x44   : > { %491 = vst [vmem:[%s933_s6 + $0x2] sm:$0x3] %v284_v51  ;;  %v319_v59 = vmul.f32 %v318_v57, %v317_v50  ;;  %v323_v60 = vstv %s504_s23  ;;  %p683_p10 = pneg %p682_p7  ;;  %p687_p0 = por %p686_p12, %p685_p11 }
  0x45   : > { %v304_v61 = vadd.f32 %v303_v48, %v300_v54  ;;  %v324_v62 = vmul.f32 %v505_v53, %v323_v60  ;;  %v328_v63 = vstv %s506_s10 }
  0x46   : > { %v320_v0 = vadd.f32 %v319_v59, %v315_v56  ;;  %v329_v1 = vmul.f32 %v507_v58, %v328_v63  ;;  %v332_v2 = vstv %s508_s22  ;;  %p688_p1 = pnand %p687_p0, %p683_p10 }
  0x47   : > { %v309_v3 = vadd.f32 %v308_v55, %v304_v61  ;;  %v333_v5 = vmul.f32 %v501_v46, %v332_v2 }
  0x48   : > { %v325_v4 = vadd.f32 %v324_v62, %v320_v0 }
  0x49   : > { %500 = vst [vmem:[%s933_s6 + $0x4] sm:$0x3] %v309_v3 }
  0x4a   : > { %v330_v6 = vadd.f32 %v329_v1, %v325_v4 }
  0x4c   : > { %v334_v7 = vadd.f32 %v333_v5, %v330_v6 }
  0x4e   : > { %509 = vst [vmem:[%s933_s6 + $0x6] sm:$0x3] %v334_v7 }
  0x4f   : > { %691 = shalt.err (!%p688_p1)
}
  0x50   : > { %s760_s18 = smov 32   ;;  %s761_s23 = smov 2  }
  0x51   : > { %527 = dma.vmem_to_hbm [thread:$0]  (%p834_p8), %s352_s15, 128, %s354_s20, %s338_s30, %s760_s18, %s760_s18, %s761_s23  }
  0x52 PF: > { %s368_s6 = sand.u32 1, %s734_s12   ;;  %p541_p2 = pnand %p468_p13, %p838_p9 }
  0x53   : > { %s369_s10 = scalar_lea.sflag [#allocation4], %s368_s6 }
  0x54   : > { %p542_p4 = pneg %p541_p2 }
  0x56   : > { %729 = dma.done.wait (%p542_p4), %s369_s10, 128  }
  0x57   : > { %731 = vsyncadd (%p542_p4), %s369_s10, 4294967168  ;;  %s21_s17 = sadd.s32 1, %s754_s17   ;;  %s1000_s12 = smov %s738_s13 }
  0x58   : > { %p18_p6 = scmp.ge.s32.totalorder %s21_s17, 4   ;;  %s1001_s13 = smov %s742_s14 }
  0x59   : > { %s1002_s14 = smov %s879_s5  ;;  %s1003_s15 = smov %s750_s16 }
  0x5a   : > { %s1004_s16 = smov %s1006_s9  ;;  %20 = sbr.rel (!%p18_p6) target bundleno = 10 (0xa), region = 93 }
  0x5f   :  { %375 = vsyncpa [#allocation3], 1 }
  0x60   :  { %377 = vsyncpa [#allocation3 + $0x1], 1 }
  0x61   :  { %378 = vsyncpa [#allocation4], 1 }
  0x62   :  { %380 = vsyncpa [#allocation4 + $0x1], 1 }
  0x63   :  { %381 = vsyncpa [#allocation5], 1 }
  0x64   :  { %383 = vsyncpa [#allocation5 + $0x1], 1 }
  0x65   :  { %384 = vsyncpa [#allocation6], 1 }
  0x66   :  { %386 = vsyncpa [#allocation6 + $0x1], 1 }

</bundles_post_ra>
